<compile_context>
chip_gen: v5e
topology: v5e:2x2
jax: 0.10.0
libtpu: 0.0.40
codegen_flags: <defaults>
</compile_context>

<pallas_src>
import jax
import jax.numpy as jnp
from jax.experimental import pallas as pl
from jax.experimental.pallas import tpu as pltpu


def _round_up(x, m):
    return -(-x // m) * m


def _seghead_kernel(w_ref, b_ref, x_ref, o_ref):
    """1x1x1 conv block: per-voxel channel mix on dense spatial slabs.

    w_ref: SMEM (Cout, Cin) f32   (scalar-prefetched)
    b_ref: SMEM (Cout,)     f32   (scalar-prefetched)
    x_ref: VMEM (1, Cin,  tS, 128)
    o_ref: VMEM (1, Cout, tS, 128)
    """
    cin = x_ref.shape[1]
    cout = o_ref.shape[1]
    slab = x_ref.shape[2:]                                  # (tS, 128) — dense
    for co in range(cout):                                  # fully unrolled: Cout*Cin VPU FMAs
        acc = jnp.full(slab, b_ref[co], dtype=jnp.float32)  # bias folded into accumulator init
        for ci in range(cin):
            acc = acc + x_ref[0, ci].astype(jnp.float32) * w_ref[co, ci]
        o_ref[0, co] = acc.astype(o_ref.dtype)              # dense (tS, 128) store


def _pick_rows_per_block(rows_total, target_rows=1024):
    """Rows (of 128 lanes) of spatial per block.

    * sublane block dim must be a multiple of 8, or equal the full extent,
    * large enough to amortize ~0.35us per-step overhead (v5e/v6e want big tiles),
    * small enough to (a) give >= 2 spatial blocks for v7x's two TensorCores even
      when N == 1 and (b) stay far below v5e's 16 MiB scoped-VMEM default
      (1024 rows: 2 MiB in + 1.5 MiB out per block, ~7 MiB double-buffered).
    """
    if rows_total <= 8:
        return rows_total                                   # == full extent, (8,128) rule ok
    rows = min(target_rows, (rows_total // 8) * 8)
    if rows_total >= 16:
        rows = min(rows, _round_up(pl.cdiv(rows_total, 2), 8))
    return max(rows, 8)


def seghead_forward(x_ncdhw, weight, bias, *, target_rows=1024):
    """1x1x1 Conv3d forward.

    x_ncdhw: (N, Cin, D, H, W)
    weight : (Cout, Cin, 1, 1, 1)   (PyTorch Conv3d layout)
    bias   : (Cout,)
    returns: (N, Cout, D, H, W), same dtype as x (f32 accumulation inside).
    """
    n, cin, d, h, w = x_ncdhw.shape
    cout = weight.shape[0]
    s = d * h * w
    rows_total = pl.cdiv(s, 128)
    s128 = rows_total * 128

    x_flat = x_ncdhw.reshape(n, cin, s)                     # pure view reshape, no transpose
    if s128 != s:
        # Only when D*H*W is not a multiple of 128: pad < 128 lanes so spatial
        # folds to (rows, 128). Typical volumes (e.g. 128^3, 96^3) skip this.
        x_flat = jnp.pad(x_flat, ((0, 0), (0, 0), (0, s128 - s)))
    x4 = x_flat.reshape(n, cin, rows_total, 128)            # spatial on (sublane, lane) axes

    ts = _pick_rows_per_block(rows_total, target_rows)
    grid = (n, pl.cdiv(rows_total, ts))

    w_mat = weight.reshape(cout, cin).astype(jnp.float32)   # (Cout, Cin) -> SMEM
    b_vec = bias.reshape(cout).astype(jnp.float32)          # (Cout,)     -> SMEM

    out4 = pl.pallas_call(
        _seghead_kernel,
        out_shape=jax.ShapeDtypeStruct((n, cout, rows_total, 128), x_ncdhw.dtype),
        grid_spec=pltpu.PrefetchScalarGridSpec(
            num_scalar_prefetch=2,                          # w_mat, b_vec land in SMEM
            grid=grid,
            in_specs=[
                # NOTE(v7x): if xprof shows exposed DMA between the smaller tiles,
                # add pipeline_mode=pl.Buffered(3) here — VMEM headroom now allows it.
                pl.BlockSpec((1, cin, ts, 128),
                             lambda b, t, w_s, b_s: (b, 0, t, 0)),
            ],
            out_specs=pl.BlockSpec((1, cout, ts, 128),
                                   lambda b, t, w_s, b_s: (b, 0, t, 0)),
        ),
        compiler_params=pltpu.CompilerParams(
            dimension_semantics=("parallel", "parallel")),
    )(w_mat, b_vec, x4)

    out_flat = out4.reshape(n, cout, s128)
    if s128 != s:
        out_flat = out_flat[:, :, :s]                       # ragged-S case only
    return out_flat.reshape(n, cout, d, h, w)


if __name__ == "__main__":
    # Small shapes consistent with Seghead(in_channels=4, out_channels=3)
    N, CIN, COUT, D, H, W = 2, 4, 3, 16, 16, 16

    key = jax.random.PRNGKey(0)
    kx, kw, kb = jax.random.split(key, 3)

    x = jax.random.normal(kx, (N, CIN, D, H, W), dtype=jnp.float32)
    # Conv3d weight layout: (Cout, Cin, 1, 1, 1)
    weight = jax.random.normal(kw, (COUT, CIN, 1, 1, 1), dtype=jnp.float32) * 0.1
    bias = jax.random.normal(kb, (COUT,), dtype=jnp.float32) * 0.1

    out = jax.block_until_ready(seghead_forward(x, weight, bias))

    # Reference: plain-JAX 1x1x1 conv (channel matmul + bias)
    ref = jnp.einsum("ncdhw,oc->nodhw", x, weight.reshape(COUT, CIN)) + \
          bias.reshape(1, COUT, 1, 1, 1)
    assert out.shape == (N, COUT, D, H, W)
    assert jnp.allclose(out, ref, atol=1e-5, rtol=1e-5)

    print("KERNEL_OK")
</pallas_src>

<mosaic_0001>
module attributes {stable_mosaic.version = 11 : i64} {
  func.func @_seghead_kernel(%arg0: i32, %arg1: i32, %arg2: memref<3x4xf32, #tpu.memory_space<smem>>, %arg3: memref<3xf32, #tpu.memory_space<smem>>, %arg4: memref<1x4x16x128xf32, #tpu.memory_space<vmem>>, %arg5: memref<1x3x16x128xf32, #tpu.memory_space<vmem>>) attributes {dimension_semantics = [#tpu.dimension_semantics<parallel>, #tpu.dimension_semantics<parallel>], iteration_bounds = array<i64: 2, 2>, scalar_prefetch = 2 : i64, scratch_operands = 0 : i64, tpu.core_type = #tpu.core_type<tc>, window_params = [{transform_indices = @transform_0, window_bounds = array<i64: 1, 4, 16, 128>}, {transform_indices = @transform_1, window_bounds = array<i64: 1, 3, 16, 128>}]} {
    %c0 = arith.constant 0 : index
    %0 = memref.load %arg3[%c0] : memref<3xf32, #tpu.memory_space<smem>>
    %1 = vector.broadcast %0 : f32 to vector<16x128xf32>
    %c0_0 = arith.constant 0 : index
    %c0_1 = arith.constant 0 : index
    %c0_2 = arith.constant 0 : index
    %c0_3 = arith.constant 0 : index
    %2 = vector.load %arg4[%c0_0, %c0_1, %c0_2, %c0_3] : memref<1x4x16x128xf32, #tpu.memory_space<vmem>>, vector<1x1x16x128xf32>
    %3 = vector.shape_cast %2 : vector<1x1x16x128xf32> to vector<16x128xf32>
    %c0_4 = arith.constant 0 : index
    %c0_5 = arith.constant 0 : index
    %4 = memref.load %arg2[%c0_4, %c0_5] : memref<3x4xf32, #tpu.memory_space<smem>>
    %5 = vector.broadcast %4 : f32 to vector<16x128xf32>
    %6 = arith.mulf %3, %5 : vector<16x128xf32>
    %7 = arith.addf %1, %6 : vector<16x128xf32>
    %c0_6 = arith.constant 0 : index
    %c1 = arith.constant 1 : index
    %c0_7 = arith.constant 0 : index
    %c0_8 = arith.constant 0 : index
    %8 = vector.load %arg4[%c0_6, %c1, %c0_7, %c0_8] : memref<1x4x16x128xf32, #tpu.memory_space<vmem>>, vector<1x1x16x128xf32>
    %9 = vector.shape_cast %8 : vector<1x1x16x128xf32> to vector<16x128xf32>
    %c0_9 = arith.constant 0 : index
    %c1_10 = arith.constant 1 : index
    %10 = memref.load %arg2[%c0_9, %c1_10] : memref<3x4xf32, #tpu.memory_space<smem>>
    %11 = vector.broadcast %10 : f32 to vector<16x128xf32>
    %12 = arith.mulf %9, %11 : vector<16x128xf32>
    %13 = arith.addf %7, %12 : vector<16x128xf32>
    %c0_11 = arith.constant 0 : index
    %c2 = arith.constant 2 : index
    %c0_12 = arith.constant 0 : index
    %c0_13 = arith.constant 0 : index
    %14 = vector.load %arg4[%c0_11, %c2, %c0_12, %c0_13] : memref<1x4x16x128xf32, #tpu.memory_space<vmem>>, vector<1x1x16x128xf32>
    %15 = vector.shape_cast %14 : vector<1x1x16x128xf32> to vector<16x128xf32>
    %c0_14 = arith.constant 0 : index
    %c2_15 = arith.constant 2 : index
    %16 = memref.load %arg2[%c0_14, %c2_15] : memref<3x4xf32, #tpu.memory_space<smem>>
    %17 = vector.broadcast %16 : f32 to vector<16x128xf32>
    %18 = arith.mulf %15, %17 : vector<16x128xf32>
    %19 = arith.addf %13, %18 : vector<16x128xf32>
    %c0_16 = arith.constant 0 : index
    %c3 = arith.constant 3 : index
    %c0_17 = arith.constant 0 : index
    %c0_18 = arith.constant 0 : index
    %20 = vector.load %arg4[%c0_16, %c3, %c0_17, %c0_18] : memref<1x4x16x128xf32, #tpu.memory_space<vmem>>, vector<1x1x16x128xf32>
    %21 = vector.shape_cast %20 : vector<1x1x16x128xf32> to vector<16x128xf32>
    %c0_19 = arith.constant 0 : index
    %c3_20 = arith.constant 3 : index
    %22 = memref.load %arg2[%c0_19, %c3_20] : memref<3x4xf32, #tpu.memory_space<smem>>
    %23 = vector.broadcast %22 : f32 to vector<16x128xf32>
    %24 = arith.mulf %21, %23 : vector<16x128xf32>
    %25 = arith.addf %19, %24 : vector<16x128xf32>
    %c0_21 = arith.constant 0 : index
    %c0_22 = arith.constant 0 : index
    %c0_23 = arith.constant 0 : index
    %c0_24 = arith.constant 0 : index
    %26 = vector.load %arg5[%c0_21, %c0_22, %c0_23, %c0_24] : memref<1x3x16x128xf32, #tpu.memory_space<vmem>>, vector<1x1x16x128xf32>
    %27 = vector.shape_cast %26 : vector<1x1x16x128xf32> to vector<16x128xf32>
    %28 = vector.shape_cast %25 : vector<16x128xf32> to vector<1x1x16x128xf32>
    tpu.vector_store %arg5[%c0_21, %c0_22, %c0_23, %c0_24], %28 {strides = array<i32>} : memref<1x3x16x128xf32, #tpu.memory_space<vmem>>, vector<1x1x16x128xf32>,
    %c1_25 = arith.constant 1 : index
    %29 = memref.load %arg3[%c1_25] : memref<3xf32, #tpu.memory_space<smem>>
    %30 = vector.broadcast %29 : f32 to vector<16x128xf32>
    %c0_26 = arith.constant 0 : index
    %c0_27 = arith.constant 0 : index
    %c0_28 = arith.constant 0 : index
    %c0_29 = arith.constant 0 : index
    %31 = vector.load %arg4[%c0_26, %c0_27, %c0_28, %c0_29] : memref<1x4x16x128xf32, #tpu.memory_space<vmem>>, vector<1x1x16x128xf32>
    %32 = vector.shape_cast %31 : vector<1x1x16x128xf32> to vector<16x128xf32>
    %c1_30 = arith.constant 1 : index
    %c0_31 = arith.constant 0 : index
    %33 = memref.load %arg2[%c1_30, %c0_31] : memref<3x4xf32, #tpu.memory_space<smem>>
    %34 = vector.broadcast %33 : f32 to vector<16x128xf32>
    %35 = arith.mulf %32, %34 : vector<16x128xf32>
    %36 = arith.addf %30, %35 : vector<16x128xf32>
    %c0_32 = arith.constant 0 : index
    %c1_33 = arith.constant 1 : index
    %c0_34 = arith.constant 0 : index
    %c0_35 = arith.constant 0 : index
    %37 = vector.load %arg4[%c0_32, %c1_33, %c0_34, %c0_35] : memref<1x4x16x128xf32, #tpu.memory_space<vmem>>, vector<1x1x16x128xf32>
    %38 = vector.shape_cast %37 : vector<1x1x16x128xf32> to vector<16x128xf32>
    %c1_36 = arith.constant 1 : index
    %c1_37 = arith.constant 1 : index
    %39 = memref.load %arg2[%c1_36, %c1_37] : memref<3x4xf32, #tpu.memory_space<smem>>
    %40 = vector.broadcast %39 : f32 to vector<16x128xf32>
    %41 = arith.mulf %38, %40 : vector<16x128xf32>
    %42 = arith.addf %36, %41 : vector<16x128xf32>
    %c0_38 = arith.constant 0 : index
    %c2_39 = arith.constant 2 : index
    %c0_40 = arith.constant 0 : index
    %c0_41 = arith.constant 0 : index
    %43 = vector.load %arg4[%c0_38, %c2_39, %c0_40, %c0_41] : memref<1x4x16x128xf32, #tpu.memory_space<vmem>>, vector<1x1x16x128xf32>
    %44 = vector.shape_cast %43 : vector<1x1x16x128xf32> to vector<16x128xf32>
    %c1_42 = arith.constant 1 : index
    %c2_43 = arith.constant 2 : index
    %45 = memref.load %arg2[%c1_42, %c2_43] : memref<3x4xf32, #tpu.memory_space<smem>>
    %46 = vector.broadcast %45 : f32 to vector<16x128xf32>
    %47 = arith.mulf %44, %46 : vector<16x128xf32>
    %48 = arith.addf %42, %47 : vector<16x128xf32>
    %c0_44 = arith.constant 0 : index
    %c3_45 = arith.constant 3 : index
    %c0_46 = arith.constant 0 : index
    %c0_47 = arith.constant 0 : index
    %49 = vector.load %arg4[%c0_44, %c3_45, %c0_46, %c0_47] : memref<1x4x16x128xf32, #tpu.memory_space<vmem>>, vector<1x1x16x128xf32>
    %50 = vector.shape_cast %49 : vector<1x1x16x128xf32> to vector<16x128xf32>
    %c1_48 = arith.constant 1 : index
    %c3_49 = arith.constant 3 : index
    %51 = memref.load %arg2[%c1_48, %c3_49] : memref<3x4xf32, #tpu.memory_space<smem>>
    %52 = vector.broadcast %51 : f32 to vector<16x128xf32>
    %53 = arith.mulf %50, %52 : vector<16x128xf32>
    %54 = arith.addf %48, %53 : vector<16x128xf32>
    %c0_50 = arith.constant 0 : index
    %c1_51 = arith.constant 1 : index
    %c0_52 = arith.constant 0 : index
    %c0_53 = arith.constant 0 : index
    %55 = vector.load %arg5[%c0_50, %c1_51, %c0_52, %c0_53] : memref<1x3x16x128xf32, #tpu.memory_space<vmem>>, vector<1x1x16x128xf32>
    %56 = vector.shape_cast %55 : vector<1x1x16x128xf32> to vector<16x128xf32>
    %57 = vector.shape_cast %54 : vector<16x128xf32> to vector<1x1x16x128xf32>
    tpu.vector_store %arg5[%c0_50, %c1_51, %c0_52, %c0_53], %57 {strides = array<i32>} : memref<1x3x16x128xf32, #tpu.memory_space<vmem>>, vector<1x1x16x128xf32>,
    %c2_54 = arith.constant 2 : index
    %58 = memref.load %arg3[%c2_54] : memref<3xf32, #tpu.memory_space<smem>>
    %59 = vector.broadcast %58 : f32 to vector<16x128xf32>
    %c0_55 = arith.constant 0 : index
    %c0_56 = arith.constant 0 : index
    %c0_57 = arith.constant 0 : index
    %c0_58 = arith.constant 0 : index
    %60 = vector.load %arg4[%c0_55, %c0_56, %c0_57, %c0_58] : memref<1x4x16x128xf32, #tpu.memory_space<vmem>>, vector<1x1x16x128xf32>
    %61 = vector.shape_cast %60 : vector<1x1x16x128xf32> to vector<16x128xf32>
    %c2_59 = arith.constant 2 : index
    %c0_60 = arith.constant 0 : index
    %62 = memref.load %arg2[%c2_59, %c0_60] : memref<3x4xf32, #tpu.memory_space<smem>>
    %63 = vector.broadcast %62 : f32 to vector<16x128xf32>
    %64 = arith.mulf %61, %63 : vector<16x128xf32>
    %65 = arith.addf %59, %64 : vector<16x128xf32>
    %c0_61 = arith.constant 0 : index
    %c1_62 = arith.constant 1 : index
    %c0_63 = arith.constant 0 : index
    %c0_64 = arith.constant 0 : index
    %66 = vector.load %arg4[%c0_61, %c1_62, %c0_63, %c0_64] : memref<1x4x16x128xf32, #tpu.memory_space<vmem>>, vector<1x1x16x128xf32>
    %67 = vector.shape_cast %66 : vector<1x1x16x128xf32> to vector<16x128xf32>
    %c2_65 = arith.constant 2 : index
    %c1_66 = arith.constant 1 : index
    %68 = memref.load %arg2[%c2_65, %c1_66] : memref<3x4xf32, #tpu.memory_space<smem>>
    %69 = vector.broadcast %68 : f32 to vector<16x128xf32>
    %70 = arith.mulf %67, %69 : vector<16x128xf32>
    %71 = arith.addf %65, %70 : vector<16x128xf32>
    %c0_67 = arith.constant 0 : index
    %c2_68 = arith.constant 2 : index
    %c0_69 = arith.constant 0 : index
    %c0_70 = arith.constant 0 : index
    %72 = vector.load %arg4[%c0_67, %c2_68, %c0_69, %c0_70] : memref<1x4x16x128xf32, #tpu.memory_space<vmem>>, vector<1x1x16x128xf32>
    %73 = vector.shape_cast %72 : vector<1x1x16x128xf32> to vector<16x128xf32>
    %c2_71 = arith.constant 2 : index
    %c2_72 = arith.constant 2 : index
    %74 = memref.load %arg2[%c2_71, %c2_72] : memref<3x4xf32, #tpu.memory_space<smem>>
    %75 = vector.broadcast %74 : f32 to vector<16x128xf32>
    %76 = arith.mulf %73, %75 : vector<16x128xf32>
    %77 = arith.addf %71, %76 : vector<16x128xf32>
    %c0_73 = arith.constant 0 : index
    %c3_74 = arith.constant 3 : index
    %c0_75 = arith.constant 0 : index
    %c0_76 = arith.constant 0 : index
    %78 = vector.load %arg4[%c0_73, %c3_74, %c0_75, %c0_76] : memref<1x4x16x128xf32, #tpu.memory_space<vmem>>, vector<1x1x16x128xf32>
    %79 = vector.shape_cast %78 : vector<1x1x16x128xf32> to vector<16x128xf32>
    %c2_77 = arith.constant 2 : index
    %c3_78 = arith.constant 3 : index
    %80 = memref.load %arg2[%c2_77, %c3_78] : memref<3x4xf32, #tpu.memory_space<smem>>
    %81 = vector.broadcast %80 : f32 to vector<16x128xf32>
    %82 = arith.mulf %79, %81 : vector<16x128xf32>
    %83 = arith.addf %77, %82 : vector<16x128xf32>
    %c0_79 = arith.constant 0 : index
    %c2_80 = arith.constant 2 : index
    %c0_81 = arith.constant 0 : index
    %c0_82 = arith.constant 0 : index
    %84 = vector.load %arg5[%c0_79, %c2_80, %c0_81, %c0_82] : memref<1x3x16x128xf32, #tpu.memory_space<vmem>>, vector<1x1x16x128xf32>
    %85 = vector.shape_cast %84 : vector<1x1x16x128xf32> to vector<16x128xf32>
    %86 = vector.shape_cast %83 : vector<16x128xf32> to vector<1x1x16x128xf32>
    tpu.vector_store %arg5[%c0_79, %c2_80, %c0_81, %c0_82], %86 {strides = array<i32>} : memref<1x3x16x128xf32, #tpu.memory_space<vmem>>, vector<1x1x16x128xf32>,
    return
  }
  func.func @transform_0(%arg0: i32, %arg1: i32, %arg2: memref<3x4xf32, #tpu.memory_space<smem>>, %arg3: memref<3xf32, #tpu.memory_space<smem>>) -> (i32, i32, i32, i32) {
    %c0_i32 = arith.constant 0 : i32
    %c0_i32_0 = arith.constant 0 : i32
    %c0_i32_1 = arith.constant 0 : i32
    return %arg0, %c0_i32, %arg1, %c0_i32_0 : i32, i32, i32, i32
  }
  func.func @transform_1(%arg0: i32, %arg1: i32, %arg2: memref<3x4xf32, #tpu.memory_space<smem>>, %arg3: memref<3xf32, #tpu.memory_space<smem>>) -> (i32, i32, i32, i32) {
    %c0_i32 = arith.constant 0 : i32
    %c0_i32_0 = arith.constant 0 : i32
    %c0_i32_1 = arith.constant 0 : i32
    return %arg0, %c0_i32, %arg1, %c0_i32_0 : i32, i32, i32, i32
  }
}

</mosaic_0001>

<bundles_post_ra>
// kernel: tpu_custom_call.1
= control target key start
LH: loop header
LB: loop body
LE: loop exit
PB: predicated region body
PF: predicated region fallthrough
CT: control target
= control target key end

     0   :  { %s693_s18 = smov [#allocation3]   ;;  %s694_s19 = smov [#allocation4]   ;;  %s954_s0 = inlined_call_operand.hbm [shape: f32[3,4], index: 0, kind: input, shape index: {}]   ;;  %s955_s2 = inlined_call_operand.hbm [shape: f32[2,4,32,128], index: 2, kind: input, shape index: {}]   ;;  %s956_s3 = inlined_call_operand.hbm [shape: f32[2,3,32,128], index: 3, kind: output, shape index: {}]   ;;  %s957_s1 = inlined_call_operand.hbm [shape: f32[3], index: 1, kind: input, shape index: {}]  }
   0x1   :  { %s9_s14 = sshll.u32 %s954_s0, 4  ;;  %s14_s17 = sshll.u32 %s957_s1, 4  ;;  %s10_s14 = int_to_ptr.hbm [resolvable:$true] %s9_s14  ;;  %s15_s17 = int_to_ptr.hbm [resolvable:$true] %s14_s17 }
   0x2   :  { %12 = dma.hbm_to_smem %s10_s14, 64, %s693_s18, [#allocation2] }
   0x3   :  { %17 = dma.hbm_to_smem %s15_s17, 16, %s694_s19, [#allocation2] }
   0x4   :  { %651 = dma.done.wait [#allocation2], 80 }
   0x5   :  { %652 = vsyncadd [#allocation2], 4294967216 }
   0x6   :  { %20 = sfence }
   0x7   :  { %21 = vsyncpa [#allocation6], 0 }
   0x8   :  { %23 = vsyncpa [#allocation6 + $0x1], 0 }
   0x9   :  { %24 = vsyncpa [#allocation7], 0 }
   0xa   :  { %26 = vsyncpa [#allocation7 + $0x1], 0  ;;  %s734_s20 = smov 0   ;;  %s736_s0 = smov 0  }
   0xb   :  { %s738_s21 = smov 0   ;;  %s740_s1 = smov 0  }
   0xc   :  { %s742_s22 = smov 0   ;;  %s744_s23 = smov 0  }
   0xd   :  { %s746_s24 = smov 0   ;;  %s748_s25 = smov 0  }
   0xe LB: > { %s441_s26 = sadd.s32 4294967295, %s691_s25   ;;  %s442_s27 = sadd.s32 4294967294, %s691_s25   ;;  %s691_s25 = sphi %s748_s25, %s32_s25   ;;  %s687_s24 = sphi %s746_s24, %s971_s24   ;;  %s683_s23 = sphi %s744_s23, %s970_s23   ;;  %s679_s22 = sphi %s742_s22, %s969_s22   ;;  %s675_s1 = sphi %s740_s1, %s968_s1   ;;  %s671_s21 = sphi %s738_s21, %s967_s21   ;;  %s667_s0 = sphi %s736_s0, %s966_s0   ;;  %s663_s20 = sphi %s734_s20, %s965_s20  }
   0xf   : > { %s41_s28 = sadd.s32 1, %s683_s23  ;;  %s44_s29 = sadd.s32 1, %s687_s24 }
  0x10   : > { %p42_p0 = scmp.ge.s32.totalorder %s41_s28, 2  ;;  %p60_p1 = scmp.ne.s32.totalorder %s671_s21, %s667_s0 }
  0x11   : > { %p61_p2 = scmp.eq.s32.totalorder %s691_s25, 0  ;;  %p66_p5 = scmp.ne.s32.totalorder %s667_s0, %s663_s20 }
  0x12   : > { %s973_s28 = smov (%p42_p0, %s41_s28), 0  ;;  %s975_s29 = smov (!%p42_p0, %s44_s29), %s687_s24 }
  0x13   : > { %s49_s30 = ssub.s32 %s683_s23, %s973_s28  ;;  %p786_p3 = por %p61_p2, %p60_p1 }
  0x14   : > { %p46_p4 = scmp.ge.s32.totalorder %s975_s29, 2  ;;  %p67_p6 = scmp.eq.s32.totalorder %s441_s26, 0 }
  0x15   : > { %p92_p7 = scmp.eq.s32.totalorder %s441_s26, 3  ;;  %p98_p10 = scmp.eq.s32.totalorder %s442_s27, 3 }
  0x16   : > { %s977_s29 = smov (%p46_p4, %s975_s29), 0  ;;  %p794_p8 = por %p67_p6, %p66_p5 }
  0x17   : > { %960 = sst [smem:[#allocation17_spill]] %s977_s29  ;;  %p798_p9 = por %p92_p7, %p60_p1 }
  0x18   : > { %s48_s7 = ssub.s32 %s687_s24, %s977_s29  ;;  %s53_s9 = sadd.s32 1, %s671_s21 }
  0x19   : > { %s50_s8 = sor.u32 %s49_s30, %s48_s7  ;;  %p805_p12 = por %p98_p10, %p66_p5 }
  0x1a   : > { %p51_p11 = scmp.eq.s32.totalorder %s50_s8, 0  ;;  %p444_p13 = scmp.ge.s32.totalorder %s691_s25, 4 }
  0x1c   : > { %s810_s11 = scalar_select %p51_p11, %s671_s21, %s53_s9  }
  0x1d   : > { %114 = sbr.rel (%p444_p13) target bundleno = 50 (0x32), region = 16 }
  0x22   : > { %s118_s12 = sand.u32 1, %s671_s21   ;;  %s446_s13 = sshll.u32 %s683_s23, 1 }
  0x23   : > { %s445_s14 = sshll.u32 %s118_s12, 6  ;;  %s447_s15 = sshll.u32 %s687_s24, 4 }
  0x24   : > { %s127_s16 = sadd.s32 %s447_s15, %s446_s13  ;;  %s122_s18 = scalar_lea.vmem [#allocation5], %s445_s14 }
  0x25   : > { %s448_s17 = sshll.u32 %s127_s16, 3  ;;  %s144_s19 = sshll.u32 %s122_s18, 4  ;;  %s145_s19 = int_to_ptr.vmem [resolvable:$true] %s144_s19 }
  0x26   : > { %s129_s30 = scalar_lea.hbm %s955_s2, %s448_s17  ;;  %s695_s8 = smov 512  }
  0x27   : > { %s494_s7 = scalar_select %p786_p3, [#allocation0], [#allocation13] }
  0x28   : > { %495 = sst [smem:[#allocation10]] (%p786_p3), %s695_s8  ;;  %s142_s29 = sshll.u32 %s129_s30, 4  ;;  %s143_s29 = int_to_ptr.hbm [resolvable:$true] %s142_s29 }
  0x29   : > { %s134_s9 = sld [smem:[%s494_s7]]   ;;  %s696_s13 = smov 256  }
  0x2a   : > { %496 = sst [smem:[#allocation10 + $0x1]] (%p786_p3), %s696_s13  ;;  %s697_s14 = smov 2  }
  0x2b   : > { %497 = sst [smem:[#allocation10 + $0x2]] (%p786_p3), %s697_s14  ;;  %s698_s15 = smov 128  }
  0x2c   : > { %498 = sst [smem:[#allocation10 + $0x3]] (%p786_p3), %s698_s15  ;;  %s699_s17 = smov 8  }
  0x2d   : > { %499 = sst [smem:[#allocation10 + $0x4]] (%p786_p3), %s698_s15  ;;  %s119_s26 = scalar_lea.sflag [#allocation6], %s118_s12 }
  0x2e   : > { %500 = sst [smem:[#allocation10 + $0x5]] (%p786_p3), %s699_s17  ;;  %s700_s27 = smov [#allocation9]  }
  0x2f   : > { %s449_s16 = sshll.u32 %s134_s9, 26 }
  0x30   : > { %s450_s18 = sadd.s32 134217728, %s449_s16 }
  0x31   : > { %501 = dma.general (%p786_p3), %s143_s29, 1024, %s145_s19, %s119_s26, %s700_s27, [#allocation10], %s450_s18, 0  }
  0x32 PF: > { %p451_p0 = scmp.ge.s32.totalorder %s691_s25, 1  ;;  %p165_p1 = scmp.lt.s32.totalorder %s691_s25, 5 }
  0x34   : > { %p166_p2 = pnand %p451_p0, %p165_p1 }
  0x35   : > { %s838_s30 = sand.u32 (!%p166_p2), 1, %s667_s0  }
  0x36   : > { %169 = sbr.rel (%p166_p2) target bundleno = 102 (0x66), region = 24  ;;  %s452_s7 = sshll.u32 (!%p166_p2), %s838_s30, 6 }
  0x37   : > { %s172_s8 = scalar_lea.sflag (!%p166_p2), [#allocation6], %s838_s30  ;;  %s175_s9 = scalar_lea.vmem (!%p166_p2), [#allocation5], %s452_s7 }
  0x3b   : > { %654 = dma.done.wait (%p794_p8), %s172_s8, 1024  }
  0x3c   : > { %656 = vsyncadd (%p794_p8), %s172_s8, 4294966272  ;;  %s197_s29 = sld [smem:[#allocation4]]  ;;  %v199_v1 = vld [vmem:[%s175_s9] sm:$0xff]  ;;  %v453_v2 = vld [vmem:[%s175_s9 + $0x10] sm:$0xff]  ;;  %s492_s26 = smul.u32 48, %s838_s30 }
  0x3d   : > { %s201_s4 = sld [smem:[#allocation3]]  ;;  %v850_v4 = vld [vmem:[%s175_s9 + $0x20] sm:$0xff]  ;;  %v200_v5 = vld [vmem:[%s175_s9 + $0x8] sm:$0xff]  ;;  %v852_v6 = vld [vmem:[%s175_s9 + $0x18] sm:$0xff] }
  0x3e   : > { %s455_s12 = sld [smem:[#allocation3 + $0x1]]  ;;  %v856_v9 = vld [vmem:[%s175_s9 + $0x30] sm:$0xff]  ;;  %v457_v11 = vld [vmem:[%s175_s9 + $0x28] sm:$0xff]  ;;  %v858_v12 = vld [vmem:[%s175_s9 + $0x38] sm:$0xff] }
  0x3f   : > { %s458_s19 = sld [smem:[#allocation3 + $0x2]] }
  0x40   : > { %s461_s13 = sld [smem:[#allocation3 + $0x3]] }
  0x41   : > { %s846_s14 = sld [smem:[#allocation4 + $0x1]] }
  0x42   : > { %v198_v0 = vstv %s197_s29  ;;  %s848_s15 = sld [smem:[#allocation3 + $0x80]]  ;;  %s888_s29 = scalar_lea.vmem [#allocation8], %s492_s26 }
  0x43   : > { %v202_v3 = vstv %s201_s4  ;;  %s854_s5 = sld [smem:[#allocation3 + $0x81]]  ;;  %s311_s4 = scalar_lea.sflag [#allocation7], %s838_s30 }
  0x44   : > { %v203_v7 = vmul.f32 %v202_v3, %v199_v1  ;;  %v211_v8 = vstv %s455_s12  ;;  %v204_v10 = vmul.f32 %v202_v3, %v200_v5  ;;  %s860_s16 = sld [smem:[#allocation3 + $0x82]] }
  0x45   : > { %v212_v13 = vmul.f32 %v453_v2, %v211_v8  ;;  %v220_v14 = vstv %s458_s19  ;;  %v213_v15 = vmul.f32 %v852_v6, %v211_v8  ;;  %s863_s17 = sld [smem:[#allocation3 + $0x83]] }
  0x46   : > { %v205_v16 = vadd.f32 %v203_v7, %v198_v0  ;;  %v221_v17 = vmul.f32 %v850_v4, %v220_v14  ;;  %v229_v18 = vstv %s461_s13  ;;  %v206_v19 = vadd.f32 %v204_v10, %v198_v0  ;;  %s866_s18 = sld [smem:[#allocation4 + $0x2]] }
  0x47   : > { %v230_v20 = vmul.f32 %v856_v9, %v229_v18  ;;  %v222_v21 = vmul.f32 %v457_v11, %v220_v14  ;;  %v231_v22 = vmul.f32 %v858_v12, %v229_v18  ;;  %s871_s27 = sld [smem:[#allocation3 + $0x100]]  ;;  %v237_v25 = vstv %s846_s14 }
  0x48   : > { %v214_v23 = vadd.f32 %v212_v13, %v205_v16  ;;  %v215_v24 = vadd.f32 %v213_v15, %v206_v19  ;;  %v241_v26 = vstv %s848_s15  ;;  %s875_s7 = sld [smem:[#allocation3 + $0x101]] }
  0x49   : > { %v242_v27 = vmul.f32 %v241_v26, %v199_v1  ;;  %v249_v28 = vstv %s854_s5  ;;  %v243_v29 = vmul.f32 %v241_v26, %v200_v5  ;;  %s878_s8 = sld [smem:[#allocation3 + $0x102]] }
  0x4a   : > { %v223_v30 = vadd.f32 %v221_v17, %v214_v23  ;;  %v224_v31 = vadd.f32 %v222_v21, %v215_v24  ;;  %v250_v32 = vmul.f32 %v453_v2, %v249_v28  ;;  %v257_v33 = vstv %s860_s16  ;;  %s881_s9 = sld [smem:[#allocation3 + $0x103]] }
  0x4b   : > { %v244_v34 = vadd.f32 %v242_v27, %v237_v25  ;;  %v258_v35 = vmul.f32 %v850_v4, %v257_v33  ;;  %v265_v36 = vstv %s863_s17  ;;  %v245_v37 = vadd.f32 %v243_v29, %v237_v25 }
  0x4c   : > { %v232_v38 = vadd.f32 %v230_v20, %v223_v30  ;;  %v233_v39 = vadd.f32 %v231_v22, %v224_v31  ;;  %v251_v40 = vmul.f32 %v852_v6, %v249_v28  ;;  %v266_v42 = vmul.f32 %v856_v9, %v265_v36 }
  0x4d   : > { %v252_v41 = vadd.f32 %v250_v32, %v244_v34  ;;  %v259_v43 = vmul.f32 %v457_v11, %v257_v33  ;;  %v267_v44 = vmul.f32 %v858_v12, %v265_v36  ;;  %v274_v46 = vstv %s866_s18 }
  0x4e   : > { %234 = vst [vmem:[%s888_s29] sm:$0xff] %v232_v38  ;;  %v253_v45 = vadd.f32 %v251_v40, %v245_v37  ;;  %v278_v47 = vstv %s871_s27  ;;  %v286_v48 = vstv %s875_s7 }
  0x4f   : > { %235 = vst [vmem:[%s888_s29 + $0x8] sm:$0xff] %v233_v39  ;;  %v260_v49 = vadd.f32 %v258_v35, %v252_v41  ;;  %v279_v50 = vmul.f32 %v278_v47, %v199_v1  ;;  %v287_v51 = vmul.f32 %v453_v2, %v286_v48  ;;  %v294_v52 = vstv %s878_s8 }
  0x50   : > { %v261_v53 = vadd.f32 %v259_v43, %v253_v45  ;;  %v302_v54 = vstv %s881_s9  ;;  %v280_v55 = vmul.f32 %v278_v47, %v200_v5  ;;  %v295_v58 = vmul.f32 %v850_v4, %v294_v52 }
  0x51   : > { %v268_v56 = vadd.f32 %v266_v42, %v260_v49  ;;  %v281_v57 = vadd.f32 %v279_v50, %v274_v46  ;;  %v288_v59 = vmul.f32 %v852_v6, %v286_v48  ;;  %v296_v62 = vmul.f32 %v457_v11, %v294_v52 }
  0x52   : > { %v269_v60 = vadd.f32 %v267_v44, %v261_v53  ;;  %v282_v61 = vadd.f32 %v280_v55, %v274_v46  ;;  %v303_v0 = vmul.f32 %v856_v9, %v302_v54  ;;  %v304_v2 = vmul.f32 %v858_v12, %v302_v54 }
  0x53   : > { %473 = vst [vmem:[%s888_s29 + $0x10] sm:$0xff] %v268_v56  ;;  %v289_v63 = vadd.f32 %v287_v51, %v281_v57 }
  0x54   : > { %474 = vst [vmem:[%s888_s29 + $0x18] sm:$0xff] %v269_v60  ;;  %v290_v1 = vadd.f32 %v288_v59, %v282_v61 }
  0x55   : > { %v297_v3 = vadd.f32 %v295_v58, %v289_v63 }
  0x56   : > { %v298_v5 = vadd.f32 %v296_v62, %v290_v1 }
  0x57   : > { %v305_v7 = vadd.f32 %v303_v0, %v297_v3 }
  0x58   : > { %v306_v8 = vadd.f32 %v304_v2, %v298_v5 }
  0x59   : > { %486 = vst [vmem:[%s888_s29 + $0x20] sm:$0xff] %v305_v7 }
  0x5a   : > { %487 = vst [vmem:[%s888_s29 + $0x28] sm:$0xff] %v306_v8 }
  0x5b   : > { %s488_s12 = sshll.u32 %s675_s1, 1  ;;  %s493_s19 = smul.u32 12, %s679_s22 }
  0x5c   : > { %s335_s13 = sshll.u32 %s888_s29, 4  ;;  %s701_s5 = smov 256   ;;  %s336_s13 = int_to_ptr.vmem [resolvable:$true] %s335_s13 }
  0x5d   : > { %s322_s14 = sadd.s32 %s493_s19, %s488_s12  ;;  %503 = sst [smem:[#allocation12]] (%p798_p9), %s701_s5 }
  0x5e   : > { %s489_s15 = sshll.u32 %s322_s14, 3  ;;  %s702_s26 = smov 512  }
  0x5f   : > { %s324_s17 = scalar_lea.hbm %s956_s3, %s489_s15  ;;  %504 = sst [smem:[#allocation12 + $0x1]] (%p798_p9), %s702_s26 }
  0x60   : > { %s337_s18 = sshll.u32 %s324_s17, 4  ;;  %s703_s1 = smov 2   ;;  %s338_s18 = int_to_ptr.hbm [resolvable:$true] %s337_s18 }
  0x61   : > { %505 = sst [smem:[#allocation12 + $0x2]] (%p798_p9), %s703_s1  ;;  %s704_s22 = smov 128  }
  0x62   : > { %506 = sst [smem:[#allocation12 + $0x3]] (%p798_p9), %s704_s22  ;;  %s705_s27 = smov 8  }
  0x63   : > { %507 = sst [smem:[#allocation12 + $0x4]] (%p798_p9), %s704_s22  ;;  %s706_s7 = smov [#allocation11]  }
  0x64   : > { %508 = sst [smem:[#allocation12 + $0x5]] (%p798_p9), %s705_s27  ;;  %s707_s8 = smov 0  }
  0x65   : > { %509 = dma.general (%p798_p9), %s336_s13, 768, %s338_s18, %s311_s4, %s706_s7, [#allocation12], %s707_s8, 0  }
  0x66 PF: > { %p515_p3 = scmp.ge.s32.totalorder %s691_s25, 2  ;;  %s365_s9 = sand.u32 1, %s663_s20  }
  0x67   : > { %s366_s29 = scalar_lea.sflag [#allocation7], %s365_s9 }
  0x68   : > { %p512_p4 = pnand %p515_p3, %p805_p12 }
  0x6a   : > { %p513_p5 = pneg %p512_p4 }
  0x6c   : > { %658 = dma.done.wait (%p513_p5), %s366_s29, 768  }
  0x6d   : > { %660 = vsyncadd (%p513_p5), %s366_s29, 4294966528  ;;  %s32_s25 = sadd.s32 1, %s691_s25   ;;  %s964_s6 = sld [smem:[#allocation17_spill]] }
  0x6e   : > { %p29_p6 = scmp.ge.s32.totalorder %s32_s25, 6   ;;  %s965_s20 = smov %s667_s0 }
  0x6f   : > { %s966_s0 = smov %s671_s21  ;;  %s967_s21 = smov %s810_s11 }
  0x70   : > { %s968_s1 = smov %s683_s23  ;;  %s969_s22 = smov %s687_s24 }
  0x71   : > { %s970_s23 = smov %s973_s28  ;;  %31 = sbr.rel (!%p29_p6) target bundleno = 14 (0xe), region = 84 }
  0x73   : > { %s971_s24 = smov %s964_s6 }
  0x76   :  { %372 = vsyncpa [#allocation6], 1 }
  0x77   :  { %374 = vsyncpa [#allocation6 + $0x1], 1 }
  0x78   :  { %375 = vsyncpa [#allocation7], 1 }
  0x79   :  { %377 = vsyncpa [#allocation7 + $0x1], 1 }

</bundles_post_ra>
